<compile_context>
chip_gen: v7x
topology: tpu7x:2x2x1
jax: 0.10.0
libtpu: 0.0.40
codegen_flags: <defaults>
</compile_context>

<pallas_src>
import jax
import jax.numpy as jnp
from jax import lax
from jax.experimental import pallas as pl
from jax.experimental.pallas import tpu as pltpu


def _round_up(x, m):
    return ((x + m - 1) // m) * m


def _pick_tile(dim, target, align):
    """Tile size (multiple of `align`, <= target) for a dim of size `dim`,
    minimizing (grid steps, padding), preferring the larger tile on ties."""
    dim_a = _round_up(dim, align)
    limit = max(align, min(target, dim_a))
    best = None
    t = align
    while t <= limit:
        padded = _round_up(dim_a, t)
        cand = (padded // t, padded - dim, -t)
        if best is None or cand < best:
            best = cand
        t += align
    return -best[2]


def _device_config():
    """(vmem_limit_bytes, n_patch_buffers) tuned per TPU generation."""
    vmem_cap = 64 * 1024 * 1024
    try:
        vmem_cap = int(getattr(pltpu.get_tpu_info(), "vmem_capacity_bytes", vmem_cap))
    except Exception:
        pass
    # 128 MiB parts (v5e/v6e) -> 96 MiB limit; 64 MiB parts (v7x) -> 48 MiB.
    vmem_limit = min(vmem_cap * 3 // 4, 100 * 1024 * 1024)
    kind = ""
    try:
        kind = jax.devices()[0].device_kind.lower()
    except Exception:
        pass
    # v5 has the lowest HBM BW: deepen the patch stream to 3 buffers there.
    n_patch_buffers = 3 if "v5" in kind else 2
    return int(vmem_limit), n_patch_buffers


def _maybe_buffered_spec(block_shape, index_map, n_buffers):
    """BlockSpec with pipeline_mode=pl.Buffered(n) when n != 2 (v5e patch stream)."""
    if n_buffers != 2:
        try:
            return pl.BlockSpec(block_shape, index_map,
                                pipeline_mode=pl.Buffered(n_buffers))
        except Exception:
            pass  # older jax without pipeline_mode: fall back to default 2-deep
    return pl.BlockSpec(block_shape, index_map)


# ----------------------------- Pallas kernels --------------------------------

def _conv_matmul_kernel(p_ref, w_ref, b_ref, o_ref):
    """One (tm, tn) f32 output tile.

    The output BlockSpec maps every k step to the same block, so o_ref stays
    VMEM-resident across the k (reduction) axis and doubles as the accumulator —
    no scratch buffer, no epilogue copy.  Bias is folded into the k==0 init.
    """
    @pl.when(pl.program_id(2) == 0)
    def _():
        o_ref[...] = jnp.broadcast_to(b_ref[...], o_ref.shape)

    o_ref[...] += jnp.dot(p_ref[...], w_ref[...],
                          preferred_element_type=jnp.float32)


def _squash_kernel(u_ref, o_ref):
    """squash over the capsule-vector axis (axis 1); lane axis = routes (dense).

    squash(u) = |u|^2 * u / ((1 + |u|^2) * |u|) == u * sqrt(|u|^2) / (1 + |u|^2)
    The simplified form avoids 0/0 on the zero-padded route columns.
    """
    u = u_ref[...].astype(jnp.float32)
    sq = jnp.sum(u * u, axis=1, keepdims=True)        # (1, 1, TR)
    scale = jnp.sqrt(sq) / (1.0 + sq)
    o_ref[...] = (u * scale).astype(o_ref.dtype)


# ------------------------------- Forward pass --------------------------------

def primary_caps_forward(x, weights, biases, *, stride=2, num_routes=None,
                         compute_dtype=jnp.bfloat16):
    """x: [B, Cin, H, W]; weights: [num_caps, out_ch, Cin, K, K]; biases: [num_caps, out_ch].

    compute_dtype: dtype of the matmul operands.  bf16 is the default on every
    TPU generation (all MXUs are bf16-native); accumulation, bias add and squash
    always run in f32.
    """
    B, Cin, H, W = x.shape
    num_caps, out_ch, _, K, _ = weights.shape
    Ho = (H - K) // stride + 1
    Wo = (W - K) // stride + 1
    if num_routes is None:
        num_routes = out_ch * Ho * Wo
    out_dtype = x.dtype
    in_bytes = jnp.dtype(compute_dtype).itemsize

    vmem_limit, n_patch_buffers = _device_config()

    # ---- im2col (gather/reshape glue, no arithmetic) -------------------------
    # Cast FIRST (halves every downstream gather/pad HBM pass on the bf16 path),
    # gather once from NHWC so patches are emitted directly in
    # (B, Ho, Wo, kh, kw, Cin) order; the tiny weight matrix is re-ordered to
    # match instead of 6-D-transposing the big patch tensor.
    # TODO(synk): patches still materialize the ~K*K/stride^2-inflated im2col
    # matrix once in HBM; fully streaming it per M tile needs in-kernel strided
    # DMA gathers (memory_space=pl.ANY) and is not done here.
    x_nhwc = jnp.transpose(x.astype(compute_dtype), (0, 2, 3, 1))        # [B,H,W,Cin]
    hh = (jnp.arange(Ho) * stride)[:, None] + jnp.arange(K)[None, :]     # [Ho, K]
    ww = (jnp.arange(Wo) * stride)[:, None] + jnp.arange(K)[None, :]     # [Wo, K]
    patches = x_nhwc[:, hh[:, None, :, None], ww[None, :, None, :], :]   # [B,Ho,Wo,K,K,Cin]
    M = B * Ho * Wo
    Kdim = K * K * Cin
    patches = patches.reshape(M, Kdim)

    # weights -> [Kdim, N], rows in (kh, kw, cin) order to match patch columns,
    # column index n = cap*out_ch + oc
    N = num_caps * out_ch
    w_mat = jnp.transpose(weights, (0, 1, 3, 4, 2)).reshape(N, Kdim).T
    b_mat = biases.reshape(1, N).astype(jnp.float32)

    # ---- tile sizes: lane-dense N, big M/K tiles, >=2 parallel tiles ----------
    tn = 128 if N <= 128 else 256
    Np = _round_up(N, tn)
    nj = Np // tn

    tm_target = 512
    if nj == 1 and M >= 32:
        # Only one j tile: make sure the parallel i axis has >= 2 tiles so both
        # v7x TensorCores get work (v5e/v6e single-TC parts are unaffected).
        tm_target = min(tm_target, _round_up((M + 1) // 2, 16))
    tm = _pick_tile(M, tm_target, 16)
    Mp = _round_up(M, tm)

    Kp128 = _round_up(Kdim, 128)
    tk = _pick_tile(Kdim, 2048, 128)
    # Weights-resident variant on 128 MiB-VMEM parts (v5e/v6e): a single K step
    # keeps the weight block index (k, j) constant across consecutive grid steps,
    # so the weight matrix is DMAed once instead of once per M tile.  At real
    # CapsNet scale this does NOT trigger on v7x (64 MiB) -> K stays tiled there.
    full_k_bytes = 2 * (tm * Kp128 + Kp128 * tn) * in_bytes + 2 * (tm * tn + tn) * 4
    if full_k_bytes <= vmem_limit // 2:
        tk = Kp128
    Kp = _round_up(Kdim, tk)

    patches_p = jnp.pad(patches, ((0, Mp - M), (0, Kp - Kdim)))
    w_p = jnp.pad(w_mat.astype(compute_dtype), ((0, Kp - Kdim), (0, Np - N)))
    b_p = jnp.pad(b_mat, ((0, 0), (0, Np - N)))

    # ---- tiled conv-as-matmul kernel (pipelined by BlockSpec) -----------------
    conv_out = pl.pallas_call(
        _conv_matmul_kernel,
        out_shape=jax.ShapeDtypeStruct((Mp, Np), jnp.float32),
        grid_spec=pltpu.PrefetchScalarGridSpec(
            num_scalar_prefetch=0,
            grid=(Mp // tm, Np // tn, Kp // tk),
            in_specs=[
                _maybe_buffered_spec((tm, tk), lambda i, j, k: (i, k),
                                     n_patch_buffers),
                pl.BlockSpec((tk, tn), lambda i, j, k: (k, j)),
                pl.BlockSpec((1, tn), lambda i, j, k: (0, j)),
            ],
            out_specs=pl.BlockSpec((tm, tn), lambda i, j, k: (i, j)),
        ),
        compiler_params=pltpu.CompilerParams(
            dimension_semantics=("parallel", "parallel", "arbitrary"),
            vmem_limit_bytes=vmem_limit,
        ),
    )(patches_p, w_p, b_p)

    # ---- torch.stack(dim=1) + .view(B, num_routes, -1) glue ------------------
    # conv_out[m, n]: m = b*Ho*Wo + p (p = ho*Wo + wo), n = cap*out_ch + oc.
    # Torch's per-batch flat order is (cap, oc, ho, wo) = n*Ho*Wo + p, i.e. one
    # transpose of the (p, n) axes, then a raw reshape to (num_routes, vec).
    vec = (num_caps * out_ch * Ho * Wo) // num_routes
    u = conv_out[:M, :N].reshape(B, Ho * Wo, N).transpose(0, 2, 1)
    u = u.reshape(B, num_routes, vec)               # exact torch .view semantics

    # ---- squash kernel on [B, vec, routes] layout (lane axis = routes) -------
    Rp = _round_up(num_routes, 128)
    TR = Rp
    if TR > 2048:
        # largest multiple of 128 that divides Rp (no wasted padded route tiles)
        TR = 128
        d = 256
        while d <= 2048:
            if Rp % d == 0:
                TR = d
            d += 128
    u_t = jnp.pad(u.transpose(0, 2, 1), ((0, 0), (0, 0), (0, Rp - num_routes)))

    squashed_t = pl.pallas_call(
        _squash_kernel,
        out_shape=jax.ShapeDtypeStruct((B, vec, Rp), out_dtype),
        grid_spec=pltpu.PrefetchScalarGridSpec(
            num_scalar_prefetch=0,
            grid=(B, Rp // TR),
            in_specs=[pl.BlockSpec((1, vec, TR), lambda b, j: (b, 0, j))],
            out_specs=pl.BlockSpec((1, vec, TR), lambda b, j: (b, 0, j)),
        ),
        compiler_params=pltpu.CompilerParams(
            dimension_semantics=("parallel", "parallel")),
    )(u_t)

    return squashed_t[:, :, :num_routes].transpose(0, 2, 1)   # [B, num_routes, vec]


# ----------------------------- Pure-JAX reference ----------------------------

def primary_caps_reference(x, weights, biases, *, stride=2, num_routes=None):
    num_caps = weights.shape[0]
    outs = []
    for c in range(num_caps):
        y = lax.conv_general_dilated(
            x, weights[c], window_strides=(stride, stride), padding="VALID",
            dimension_numbers=("NCHW", "OIHW", "NCHW"))
        y = y + biases[c][None, :, None, None]
        outs.append(y)
    u = jnp.stack(outs, axis=1)                     # [B, num_caps, out_ch, Ho, Wo]
    B = x.shape[0]
    u = u.reshape(B, num_routes, -1)
    sq = jnp.sum(u * u, axis=-1, keepdims=True)
    return sq * u / ((1.0 + sq) * jnp.sqrt(sq))


# ----------------------------------- Main -------------------------------------

if __name__ == "__main__":
    key = jax.random.PRNGKey(0)
    # Small shapes consistent with the module (scaled down from 256ch/9x9/32*6*6)
    B, Cin, H, W = 2, 8, 13, 13
    num_caps, out_ch, K, stride = 8, 4, 3, 2
    Ho = (H - K) // stride + 1                      # 6
    Wo = (W - K) // stride + 1                      # 6
    num_routes = out_ch * Ho * Wo                   # 4 * 6 * 6 = 144

    kx, kw, kb = jax.random.split(key, 3)
    x = jax.random.normal(kx, (B, Cin, H, W), dtype=jnp.float32)
    fan_in = Cin * K * K
    bound = float(1.0 / (fan_in ** 0.5))            # PyTorch-default-style uniform init
    weights = jax.random.uniform(kw, (num_caps, out_ch, Cin, K, K), jnp.float32,
                                 minval=-bound, maxval=bound)
    biases = jax.random.uniform(kb, (num_caps, out_ch), jnp.float32,
                                minval=-bound, maxval=bound)

    ref = primary_caps_reference(x, weights, biases, stride=stride,
                                 num_routes=num_routes)

    # f32 operands: exact-precision path
    out_f32 = primary_caps_forward(x, weights, biases, stride=stride,
                                   num_routes=num_routes,
                                   compute_dtype=jnp.float32)
    out_f32 = jax.block_until_ready(out_f32)
    assert out_f32.shape == (B, num_routes, num_caps), out_f32.shape
    assert jnp.allclose(out_f32, ref, atol=1e-5, rtol=1e-5), \
        float(jnp.max(jnp.abs(out_f32 - ref)))

    # default path: bf16 MXU operands (fast path on every generation), f32 accumulation
    out_bf16 = primary_caps_forward(x, weights, biases, stride=stride,
                                    num_routes=num_routes)
    out_bf16 = jax.block_until_ready(out_bf16)
    assert out_bf16.shape == (B, num_routes, num_caps), out_bf16.shape
    assert jnp.allclose(out_bf16, ref, atol=5e-2, rtol=5e-2), \
        float(jnp.max(jnp.abs(out_bf16 - ref)))

    print("KERNEL_OK")
</pallas_src>

<mosaic_0001>
module attributes {stable_mosaic.version = 11 : i64} {
  func.func @_conv_matmul_kernel(%arg0: i32, %arg1: i32, %arg2: i32, %arg3: memref<48x128xf32, #tpu.memory_space<vmem>>, %arg4: memref<128x128xf32, #tpu.memory_space<vmem>>, %arg5: memref<1x128xf32, #tpu.memory_space<vmem>>, %arg6: memref<48x128xf32, #tpu.memory_space<vmem>>) attributes {dimension_semantics = [#tpu.dimension_semantics<parallel>, #tpu.dimension_semantics<parallel>, #tpu.dimension_semantics<arbitrary>], iteration_bounds = array<i64: 2, 1, 1>, scalar_prefetch = 0 : i64, scratch_operands = 0 : i64, tpu.core_type = #tpu.core_type<tc>, window_params = [{transform_indices = @transform_0, window_bounds = array<i64: 48, 128>}, {transform_indices = @transform_1, window_bounds = array<i64: 128, 128>}, {transform_indices = @transform_2, window_bounds = array<i64: 1, 128>}, {transform_indices = @transform_3, window_bounds = array<i64: 48, 128>}]} {
    %c0_i32 = arith.constant 0 : i32
    %0 = arith.cmpi eq, %arg2, %c0_i32 : i32
    %1 = arith.extui %0 : i1 to i32
    %c0_i32_0 = arith.constant 0 : i32
    %2 = arith.cmpi ne, %1, %c0_i32_0 : i32
    scf.if %2 {
      %c0_8 = arith.constant 0 : index
      %c0_9 = arith.constant 0 : index
      %9 = vector.load %arg5[%c0_8, %c0_9] : memref<1x128xf32, #tpu.memory_space<vmem>>, vector<1x128xf32>
      %10 = vector.shape_cast %9 : vector<1x128xf32> to vector<1x128xf32>
      %11 = vector.broadcast %10 : vector<1x128xf32> to vector<48x128xf32>
      %c0_10 = arith.constant 0 : index
      %c0_11 = arith.constant 0 : index
      %12 = vector.load %arg6[%c0_10, %c0_11] : memref<48x128xf32, #tpu.memory_space<vmem>>, vector<48x128xf32>
      tpu.vector_store %arg6[%c0_10, %c0_11], %11 {strides = array<i32>} : memref<48x128xf32, #tpu.memory_space<vmem>>, vector<48x128xf32>,
    } else {
    }
    %c0 = arith.constant 0 : index
    %c0_1 = arith.constant 0 : index
    %3 = vector.load %arg6[%c0, %c0_1] : memref<48x128xf32, #tpu.memory_space<vmem>>, vector<48x128xf32>
    %c0_2 = arith.constant 0 : index
    %c0_3 = arith.constant 0 : index
    %4 = vector.load %arg3[%c0_2, %c0_3] : memref<48x128xf32, #tpu.memory_space<vmem>>, vector<48x128xf32>
    %c0_4 = arith.constant 0 : index
    %c0_5 = arith.constant 0 : index
    %5 = vector.load %arg4[%c0_4, %c0_5] : memref<128x128xf32, #tpu.memory_space<vmem>>, vector<128x128xf32>
    %cst = arith.constant dense<0.000000e+00> : vector<48x128xf32>
    %6 = tpu.matmul %4, %5, %cst {dimension_numbers = #tpu.dot_dimension_numbers<[1], [0], [0], [1], [0, 0, 1, 1], [], []>} : vector<48x128xf32>, vector<128x128xf32>, vector<48x128xf32> -> vector<48x128xf32>
    %7 = arith.addf %3, %6 : vector<48x128xf32>
    %c0_6 = arith.constant 0 : index
    %c0_7 = arith.constant 0 : index
    %8 = vector.load %arg6[%c0_6, %c0_7] : memref<48x128xf32, #tpu.memory_space<vmem>>, vector<48x128xf32>
    tpu.vector_store %arg6[%c0_6, %c0_7], %7 {strides = array<i32>} : memref<48x128xf32, #tpu.memory_space<vmem>>, vector<48x128xf32>,
    return
  }
  func.func @transform_0(%arg0: i32, %arg1: i32, %arg2: i32) -> (i32, i32) {
    %c0_i32 = arith.constant 0 : i32
    return %arg0, %arg2 : i32, i32
  }
  func.func @transform_1(%arg0: i32, %arg1: i32, %arg2: i32) -> (i32, i32) {
    %c0_i32 = arith.constant 0 : i32
    return %arg2, %arg1 : i32, i32
  }
  func.func @transform_2(%arg0: i32, %arg1: i32, %arg2: i32) -> (i32, i32) {
    %c0_i32 = arith.constant 0 : i32
    %c0_i32_0 = arith.constant 0 : i32
    return %c0_i32, %arg1 : i32, i32
  }
  func.func @transform_3(%arg0: i32, %arg1: i32, %arg2: i32) -> (i32, i32) {
    %c0_i32 = arith.constant 0 : i32
    return %arg0, %arg1 : i32, i32
  }
}

</mosaic_0001>

<bundles_post_ra>
// kernel: tpu_custom_call.1
= control target key start
LH: loop header
LB: loop body
LE: loop exit
PB: predicated region body
PF: predicated region fallthrough
CT: control target
= control target key end

     0   :  { %8 = vsyncpa [#allocation3], 0  ;;  %s1149_s0 = inlined_call_operand.hbm [shape: f32[96,128], index: 0, kind: input, shape index: {}]   ;;  %s1150_s1 = inlined_call_operand.hbm [shape: f32[128,128], index: 1, kind: input, shape index: {}]   ;;  %s1151_s2 = inlined_call_operand.vmem [shape: f32[1,128], index: 2, kind: input, shape index: {}]   ;;  %s1152_s3 = inlined_call_operand.hbm [shape: f32[96,128], index: 3, kind: output, shape index: {}]  }
   0x1   :  { %10 = vsyncpa [#allocation3 + $0x1], 0 }
   0x2   :  { %11 = vsyncpa [#allocation6], 0 }
   0x3   :  { %12 = vsyncpa [#allocation4], 0 }
   0x4   :  { %14 = vsyncpa [#allocation4 + $0x1], 0  ;;  %s915_s12 = smov 0   ;;  %s917_s13 = smov 0  }
   0x5   :  { %s919_s14 = smov 0   ;;  %s921_s15 = smov 0  }
   0x6   :  { %s923_s16 = smov 0   ;;  %s925_s17 = smov 0  }
   0x7 LB: > { %s537_s18 = sadd.s32 4294967295, %s886_s17   ;;  %s538_s19 = sadd.s32 4294967294, %s886_s17   ;;  %s886_s17 = sphi %s925_s17, %s20_s17   ;;  %s882_s16 = sphi %s923_s16, %s1175_s16   ;;  %s878_s15 = sphi %s921_s15, %s1174_s15   ;;  %s874_s14 = sphi %s919_s14, %s1173_s14   ;;  %s870_s13 = sphi %s917_s13, %s1172_s13   ;;  %s866_s12 = sphi %s915_s12, %s1171_s12  }
   0x8   : > { %p61_p0 = scmp.ne.s32.totalorder %s870_s13, %s866_s12  ;;  %p949_p1 = scmp.eq.s32.totalorder %s537_s18, 0 }
   0x9   : > { %p953_p2 = scmp.eq.s32.totalorder %s537_s18, 1  ;;  %p147_p3 = scmp.eq.s32.totalorder %s538_s19, 1 }
   0xa   : > { %s1157_s20 = scalar_select %p949_p1, 1, 0 }
   0xb   : > { %s1158_s21 = scalar_select %p953_p2, 1, 0 }
   0xc   : > { %p959_p4 = por %p949_p1, %p61_p0  ;;  %p539_p5 = scmp.ge.s32.totalorder %s886_s17, 1 }
   0xd   : > { %p964_p6 = por %p147_p3, %p61_p0  ;;  %p154_p7 = scmp.lt.s32.totalorder %s886_s17, 3 }
   0xe   : > { %s1159_s22 = scalar_select %p959_p4, 1, 0 }
   0xf   : > { %s1160_s23 = scalar_select %p964_p6, 1, 0 }
  0x10   : > { %p969_p8 = pnand %p539_p5, %p154_p7  ;;  %s888_s25 = smov [#allocation5]  }
  0x11   : > { %s170_s26 = sshll.u32 %s888_s25, 4  ;;  %s39_s28 = sadd.s32 1, %s882_s16  ;;  %s171_s26 = int_to_ptr.vmem [resolvable:$true] %s170_s26 }
  0x12   : > { %s1161_s24 = scalar_select %p969_p8, 1, 0 }
  0x13   : > { %p673_p9 = pneg %p969_p8  ;;  %s742_s4 = scalar_lea.hbm %s1150_s1, 2048 }
  0x14   : > { %p743_p12 = scmp.ne.s32.totalorder %s1150_s1, %s742_s4  ;;  %p749_p5 = scmp.lt.u32.totalorder %s742_s4, %s1150_s1 }
  0x15   : > { %p978_p11 = pnand %p673_p9, %p949_p1 }
  0x17   : > { %p744_p13 = pneg %p978_p11 }
  0x19   : > { %p745_p0 = pnand %p744_p13, %p743_p12 }
  0x1b   : > { %p746_p3 = pneg %p745_p0 }
  0x1d   : > { %p751_p7 = pnand %p749_p5, %p746_p3 }
  0x1f   : > { %754 = shalt.err (!%p751_p7)
}
  0x20   : > { %s755_s9 = scalar_lea.vmem %s171_s26, 2048  ;;  %p763_p1 = scmp.lt.s32.totalorder %s171_s26, %s171_s26 }
  0x21   : > { %p756_p9 = scmp.ne.s32.totalorder %s171_s26, %s755_s9  ;;  %p764_p4 = scmp.lt.s32.totalorder %s755_s9, %s755_s9 }
  0x23   : > { %p758_p10 = pnand %p756_p9, %p744_p13  ;;  %p765_p8 = por %p764_p4, %p763_p1 }
  0x25   : > { %p759_p6 = pneg %p758_p10 }
  0x27   : > { %p766_p2 = pnand %p765_p8, %p759_p6 }
  0x29   : > { %769 = shalt.err (!%p766_p2)
}
  0x2a   : > { %s889_s10 = smov 128   ;;  %s890_s11 = smov 8  }
  0x2b   : > { %676 = dma.hbm_to_vmem [thread:$0]  (!%p978_p11), %s1150_s1, 2048, %s171_s26, [#allocation6], %s889_s10, %s889_s10, %s890_s11  }
  0x2c   : > { %p41_p1 = scmp.ge.s32.totalorder %s39_s28, 2  ;;  %s48_s25 = sadd.s32 1, %s874_s14 }
  0x2d   : > { %p55_p2 = scmp.ne.s32.totalorder %s874_s14, %s870_s13  ;;  %p56_p4 = scmp.eq.s32.totalorder %s886_s17, 0 }
  0x2e   : > { %s1177_s28 = smov (%p41_p1, %s39_s28), 0  ;;  %p1163_p8 = scmp.ne.s32.totalorder %s1158_s21, 0 }
  0x2f   : > { %p57_p6 = por %p56_p4, %p55_p2  ;;  %s43_s27 = ssub.s32 %s882_s16, %s1177_s28 }
  0x30   : > { %p1010_p10 = por %p1163_p8, %p55_p2  ;;  %p686_p12 = scmp.lt.s32.totalorder %s886_s17, 2 }
  0x31   : > { %p46_p13 = scmp.eq.s32.totalorder %s43_s27, 0  ;;  %s190_s30 = sand.u32 1, %s874_s14  }
  0x32   : > { %s663_s4 = smul.u32 48, %s190_s30  ;;  %p1022_p11 = pnand %p686_p12, %p57_p6 }
  0x33   : > { %s1019_s5 = scalar_select %p46_p13, %s874_s14, %s48_s25  }
  0x34   : > { %s550_s26 = smul.u32 768, %s882_s16  ;;  %s194_s6 = scalar_lea.vmem [#allocation2], %s663_s4 }
  0x35   : > { %s202_s7 = sshll.u32 %s194_s6, 4  ;;  %s1033_s19 = scalar_lea.sflag [#allocation3], %s190_s30  ;;  %s1031_s7 = int_to_ptr.vmem [resolvable:$true] %s202_s7 }
  0x36   : > { %s1029_s18 = scalar_lea.hbm %s1149_s0, %s550_s26  ;;  %p772_p3 = pneg %p1022_p11 }
  0x37   : > { %s770_s25 = scalar_lea.hbm %s1029_s18, 768  ;;  %s775_s26 = scalar_lea.hbm %s1149_s0, 1536 }
  0x38   : > { %p771_p0 = scmp.ne.s32.totalorder %s1029_s18, %s770_s25  ;;  %p776_p9 = scmp.lt.u32.totalorder %s1029_s18, %s1149_s0 }
  0x39   : > { %p777_p1 = scmp.lt.u32.totalorder %s775_s26, %s770_s25  ;;  %p779_p4 = scmp.lt.u32.totalorder %s770_s25, %s1029_s18 }
  0x3a   : > { %p773_p5 = pnand %p772_p3, %p771_p0 }
  0x3b   : > { %p778_p2 = por %p777_p1, %p776_p9 }
  0x3c   : > { %p774_p7 = pneg %p773_p5 }
  0x3d   : > { %p780_p6 = por %p779_p4, %p778_p2 }
  0x3f   : > { %p781_p8 = pnand %p780_p6, %p774_p7 }
  0x41   : > { %784 = shalt.err (!%p781_p8)
}
  0x42   : > { %s785_s30 = scalar_lea.vmem %s1031_s7, 768  ;;  %s891_s21 = smov [#allocation2]  }
  0x43   : > { %p786_p12 = scmp.ne.s32.totalorder %s1031_s7, %s785_s30  ;;  %s790_s27 = sshll.u32 %s891_s21, 4  ;;  %s791_s27 = int_to_ptr.vmem [resolvable:$false] %s790_s27 }
  0x44   : > { %s792_s4 = scalar_lea.vmem %s791_s27, 1536  ;;  %p793_p5 = scmp.lt.s32.totalorder %s1031_s7, %s791_s27 }
  0x45   : > { %p788_p13 = pnand %p786_p12, %p772_p3  ;;  %p794_p9 = scmp.lt.s32.totalorder %s792_s4, %s785_s30 }
  0x47   : > { %p789_p0 = pneg %p788_p13  ;;  %p795_p1 = por %p794_p9, %p793_p5 }
  0x49   : > { %p796_p2 = pnand %p795_p1, %p789_p0 }
  0x4b   : > { %799 = shalt.err (!%p796_p2)
}
  0x4c   : > { %680 = dma.hbm_to_vmem [thread:$0]  (!%p1022_p11), %s1029_s18, 768, %s1031_s7, %s1033_s19, %s889_s10, %s889_s10, %s890_s11  }
  0x4d   : > { %p1166_p3 = scmp.ne.s32.totalorder %s1161_s24, 0 }
  0x4e   : > { %s1067_s25 = sand.u32 (!%p1166_p3), 1, %s870_s13   ;;  %p1167_p7 = scmp.ne.s32.totalorder (!%p1166_p3), %s1159_s22, 0 }
  0x4f   : > { %214 = sbr.rel (%p1166_p3) target bundleno = 359 (0x167), region = 32  ;;  %s217_s6 = scalar_lea.sflag (!%p1166_p3), [#allocation3], %s1067_s25 }
  0x50   : > { %s664_s26 = smul.u32 (!%p1166_p3), 48, %s1067_s25 }
  0x52   : > { %s1073_s8 = scalar_lea.vmem (!%p1166_p3), [#allocation2], %s664_s26 }
  0x56   : > { %853 = dma.done.wait (%p1167_p7), %s217_s6, 768  }
  0x57   : > { %855 = vsyncadd (%p1167_p7), %s217_s6, 4294966528  ;;  %p1168_p11 = scmp.ne.s32.totalorder %s1157_s20, 0 }
  0x59   : > { %857 = dma.done.wait (%p1168_p11), [#allocation6], 2048  }
  0x5a   : > { %859 = vsyncadd (%p1168_p11), [#allocation6], 4294965248  ;;  %v285_v0 = vld [vmem:[#allocation5] sm:$0xff]  ;;  %v286_v1 = vld [vmem:[#allocation5 + $0x8] sm:$0xff]  ;;  %s551_s24 = smul.u32 768, %s878_s15  ;;  %s249_s10 = scalar_lea.vmem [#allocation7], %s664_s26 }
  0x5b   : > { %v287_v2 = vld [vmem:[#allocation5 + $0x10] sm:$0xff]  ;;  %v615_v3 = vpack.c.bf16 %v286_v1, %v285_v0  ;;  %v288_v4 = vld [vmem:[#allocation5 + $0x18] sm:$0xff]  ;;  %v289_v6 = vld [vmem:[#allocation5 + $0x20] sm:$0xff]  ;;  %s423_s11 = sshll.u32 %s249_s10, 4  ;;  %s409_s15 = scalar_lea.sflag [#allocation4], %s1067_s25  ;;  %s1100_s11 = int_to_ptr.vmem [resolvable:$true] %s423_s11 }
  0x5c   : > { %v619_v5 = vpack.c.bf16 %v288_v4, %v287_v2  ;;  %v290_v7 = vld [vmem:[#allocation5 + $0x28] sm:$0xff]  ;;  %v281_v9 = vld [vmem:[%s1073_s8 + $0x10] sm:$0xff]  ;;  %v292_v11 = vld [vmem:[#allocation5 + $0x38] sm:$0xff]  ;;  %s1098_s19 = scalar_lea.hbm %s1152_s3, %s551_s24  ;;  %s800_s9 = scalar_lea.vmem %s1100_s11, 768 }
  0x5d   : > { %647 = vmatprep.subr.bf16.mxu1 %v615_v3  ;;  %616 = vmatprep.subr.bf16.mxu0 %v615_v3  ;;  %v623_v8 = vpack.c.bf16 %v290_v7, %v289_v6  ;;  %v291_v10 = vld [vmem:[#allocation5 + $0x30] sm:$0xff]  ;;  %v293_v14 = vld [vmem:[#allocation5 + $0x40] sm:$0xff]  ;;  %v294_v15 = vld [vmem:[#allocation5 + $0x48] sm:$0xff]  ;;  %p801_p4 = scmp.ne.s32.totalorder %s1100_s11, %s800_s9  ;;  %s892_s30 = smov [#allocation7]  }
  0x5e   : > { %655 = vmatpush3.bf16.msra.mxu1 %v615_v3  ;;  %618 = vmatpush3.bf16.msra.mxu0 %v615_v3  ;;  %v279_v12 = vld [vmem:[%s1073_s8] sm:$0xff]  ;;  %v627_v13 = vpack.c.bf16 %v292_v11, %v291_v10  ;;  %v631_v16 = vpack.c.bf16 %v294_v15, %v293_v14  ;;  %v296_v18 = vld [vmem:[#allocation5 + $0x58] sm:$0xff]  ;;  %v298_v21 = vld [vmem:[#allocation5 + $0x68] sm:$0xff]  ;;  %s804_s21 = sshll.u32 %s892_s30, 4  ;;  %s805_s21 = int_to_ptr.vmem [resolvable:$false] %s804_s21 }
  0x5f   : > { %648 = vmatprep.subr.bf16.mxu1 %v619_v5  ;;  %620 = vmatprep.subr.bf16.mxu0 %v619_v5  ;;  %v295_v17 = vld [vmem:[#allocation5 + $0x50] sm:$0xff]  ;;  %v297_v20 = vld [vmem:[#allocation5 + $0x60] sm:$0xff]  ;;  %v300_v24 = vld [vmem:[#allocation5 + $0x78] sm:$0xff]  ;;  %p802_p6 = pnand %p801_p4, %p1010_p10  ;;  %s806_s27 = scalar_lea.vmem %s805_s21, 1536 }
  0x60   : > { %609 = vmatprep.mubr.f32.mxu1 %v281_v9  ;;  %606 = vmatprep.mubr.f32.mxu0 %v279_v12  ;;  %v635_v19 = vpack.c.bf16 %v296_v18, %v295_v17  ;;  %v639_v22 = vpack.c.bf16 %v298_v21, %v297_v20  ;;  %v299_v23 = vld [vmem:[#allocation5 + $0x70] sm:$0xff]  ;;  %v282_v26 = vld [vmem:[%s1073_s8 + $0x18] sm:$0xff]  ;;  %v280_v27 = vld [vmem:[%s1073_s8 + $0x8] sm:$0xff]  ;;  %p807_p12 = scmp.lt.s32.totalorder %s1100_s11, %s805_s21  ;;  %p808_p13 = scmp.lt.s32.totalorder %s806_s27, %s800_s9 }
  0x61   : > { %v643_v25 = vpack.c.bf16 %v300_v24, %v299_v23  ;;  %v283_v28 = vld [vmem:[%s1073_s8 + $0x20] sm:$0xff]  ;;  %v284_v29 = vld [vmem:[%s1073_s8 + $0x28] sm:$0xff]  ;;  %p803_p8 = pneg %p802_p6 }
  0x62   : > { %656 = vmatpush3.bf16.msra.mxu1 %v619_v5  ;;  %622 = vmatpush3.bf16.msra.mxu0 %v619_v5  ;;  %v546_v30 = vld [vmem:[%s1151_s2] ss:$0 sm:$0xff]  ;;  %p809_p0 = por %p808_p13, %p807_p12 }
  0x63   : > { %649 = vmatprep.subr.bf16.mxu1 %v623_v8  ;;  %624 = vmatprep.subr.bf16.mxu0 %v623_v8 }
  0x64   : > { %p810_p5 = pnand %p809_p0, %p803_p8 }
  0x66   : > { %657 = vmatpush3.bf16.msra.mxu1 %v623_v8  ;;  %626 = vmatpush3.bf16.msra.mxu0 %v623_v8 }
  0x67   : > { %650 = vmatprep.subr.bf16.mxu1 %v627_v13  ;;  %628 = vmatprep.subr.bf16.mxu0 %v627_v13 }
  0x6a   : > { %658 = vmatpush3.bf16.msra.mxu1 %v627_v13  ;;  %630 = vmatpush3.bf16.msra.mxu0 %v627_v13 }
  0x6b   : > { %651 = vmatprep.subr.bf16.mxu1 %v631_v16  ;;  %632 = vmatprep.subr.bf16.mxu0 %v631_v16 }
  0x6e   : > { %659 = vmatpush3.bf16.msra.mxu1 %v631_v16  ;;  %634 = vmatpush3.bf16.msra.mxu0 %v631_v16 }
  0x6f   : > { %652 = vmatprep.subr.bf16.mxu1 %v635_v19  ;;  %636 = vmatprep.subr.bf16.mxu0 %v635_v19 }
  0x72   : > { %660 = vmatpush3.bf16.msra.mxu1 %v635_v19  ;;  %638 = vmatpush3.bf16.msra.mxu0 %v635_v19 }
  0x73   : > { %653 = vmatprep.subr.bf16.mxu1 %v639_v22  ;;  %640 = vmatprep.subr.bf16.mxu0 %v639_v22 }
  0x76   : > { %661 = vmatpush3.bf16.msra.mxu1 %v639_v22  ;;  %642 = vmatpush3.bf16.msra.mxu0 %v639_v22 }
  0x77   : > { %654 = vmatprep.subr.bf16.mxu1 %v643_v25  ;;  %644 = vmatprep.subr.bf16.mxu0 %v643_v25 }
  0x7a   : > { %662 = vmatpush3.bf16.msra.mxu1 %v643_v25  ;;  %646 = vmatpush3.bf16.msra.mxu0 %v643_v25 }
  0x7d   : > { %610 = vmatmul.mubr.f32.vlgmr.msra.gmra.mrb[0].mxu1 %v282_v26  ;;  %607 = vmatmul.mubr.f32.vlgmr.msra.gmra.mrb[0].mxu0 %v280_v27 }
  0x7e   : > { %612 = vmatprep.mubr.f32.mxu1 %v283_v28 }
  0x81   : > { %613 = vmatmul.mubr.f32.gmra.mrb[2].mxu1 %v284_v29 }
 0x150   : > { %v611_v31 = vpop.f32.mrb[0].mxu1  ;;  %v608_v32 = vpop.f32.mrb[0].mxu0 }
 0x151   : > { %v399_v33 = vadd.f32 %v611_v31, %v546_v30  ;;  %v377_v34 = vpop.f32.mrb[1].mxu1  ;;  %v397_v35 = vadd.f32 %v608_v32, %v546_v30  ;;  %v367_v36 = vpop.f32.mrb[1].mxu0 }
 0x152   : > { %v398_v37 = vadd.f32 %v546_v30, %v377_v34  ;;  %v396_v38 = vadd.f32 %v546_v30, %v367_v36 }
 0x153   : > { %405 = vst [vmem:[%s249_s10 + $0x18] sm:$0xff] %v399_v33  ;;  %403 = vst [vmem:[%s249_s10 + $0x8] sm:$0xff] %v397_v35 }
 0x154   : > { %404 = vst [vmem:[%s249_s10 + $0x10] sm:$0xff] %v398_v37  ;;  %402 = vst [vmem:[%s249_s10] sm:$0xff] %v396_v38  ;;  %v614_v39 = vpop.f32.mrb[2].mxu1 }
 0x155   : > { %v401_v40 = vadd.f32 %v614_v39, %v546_v30  ;;  %v387_v41 = vpop.f32.mrb[3].mxu1 }
 0x156   : > { %v400_v42 = vadd.f32 %v546_v30, %v387_v41 }
 0x157   : > { %407 = vst [vmem:[%s249_s10 + $0x28] sm:$0xff] %v401_v40 }
 0x158   : > { %406 = vst [vmem:[%s249_s10 + $0x20] sm:$0xff] %v400_v42 }
 0x159   : > { %813 = shalt.err (!%p810_p5)
}
 0x15a   : > { %s814_s4 = scalar_lea.hbm %s1098_s19, 768  ;;  %s818_s8 = scalar_lea.hbm %s1152_s3, 1536 }
 0x15b   : > { %p815_p9 = scmp.ne.s32.totalorder %s1098_s19, %s814_s4  ;;  %p819_p3 = scmp.lt.u32.totalorder %s1098_s19, %s1152_s3 }
 0x15c   : > { %p820_p7 = scmp.lt.u32.totalorder %s818_s8, %s814_s4  ;;  %p822_p4 = scmp.lt.u32.totalorder %s814_s4, %s1098_s19 }
 0x15d   : > { %p816_p1 = pnand %p815_p9, %p1010_p10 }
 0x15e   : > { %p821_p11 = por %p820_p7, %p819_p3 }
 0x15f   : > { %p817_p2 = pneg %p816_p1 }
 0x160   : > { %p823_p6 = por %p822_p4, %p821_p11 }
 0x162   : > { %p824_p8 = pnand %p823_p6, %p817_p2 }
 0x164   : > { %827 = shalt.err (!%p824_p8)
}
 0x165   : > { %s893_s24 = smov 128   ;;  %s894_s10 = smov 8  }
 0x166   : > { %671 = dma.vmem_to_hbm [thread:$0]  (%p1010_p10), %s1100_s11, 768, %s1098_s19, %s409_s15, %s893_s24, %s893_s24, %s894_s10  }
 0x167 PF: > { %s438_s7 = sand.u32 1, %s866_s12   ;;  %p1169_p12 = scmp.ne.s32.totalorder %s1160_s23, 0 }
 0x168   : > { %p1170_p13 = scmp.ge.s32.totalorder %s886_s17, 2  ;;  %s439_s18 = scalar_lea.sflag [#allocation4], %s438_s7 }
 0x16a   : > { %p682_p0 = pnand %p1170_p13, %p1169_p12 }
 0x16c   : > { %861 = dma.done.wait (!%p682_p0), %s439_s18, 768  }
 0x16d   : > { %863 = vsyncadd (!%p682_p0), %s439_s18, 4294966528  ;;  %s20_s17 = sadd.s32 1, %s886_s17   ;;  %s1171_s12 = smov %s870_s13 }
 0x16e   : > { %p17_p5 = scmp.ge.s32.totalorder %s20_s17, 4   ;;  %s1172_s13 = smov %s874_s14 }
 0x16f   : > { %s1173_s14 = smov %s1019_s5  ;;  %s1174_s15 = smov %s882_s16 }
 0x170   : > { %s1175_s16 = smov %s1177_s28  ;;  %19 = sbr.rel (!%p17_p5) target bundleno = 7 (0x7), region = 89 }
 0x177   :  { %444 = vsyncpa [#allocation3], 1 }
 0x178   :  { %446 = vsyncpa [#allocation3 + $0x1], 1 }
 0x179   :  { %447 = vsyncpa [#allocation6], 1 }
 0x17a   :  { %448 = vsyncpa [#allocation4], 1 }
 0x17b   :  { %450 = vsyncpa [#allocation4 + $0x1], 1 }

</bundles_post_ra>
